<compile_context>
chip_gen: v7x
topology: tpu7x:2x2x1
jax: 0.10.0
libtpu: 0.0.40
codegen_flags: <defaults>
</compile_context>

<pallas_src>
import math
from functools import partial

import jax
import jax.numpy as jnp
from jax.experimental import pallas as pl
from jax.experimental.pallas import tpu as pltpu


def _encoder_attn_kernel(xq_ref, xkv_ref, wq_ref, bq_ref, wkv_ref, bkv_ref,
                         gamma_ref, beta_ref, out_ref, k_sc, v_sc,
                         *, hidden_size, seq_len, kv_chunk, eps):
    qi = pl.program_id(1)

    # ---- K / V projections: once per batch element, chunked, cached in bf16 VMEM ----
    @pl.when(qi == 0)
    def _():
        n_chunks = seq_len // kv_chunk            # static
        for c in range(n_chunks):                 # static offsets; bounded f32 temporaries
            r0 = c * kv_chunk
            xb = xkv_ref[0, pl.ds(r0, kv_chunk), :]                       # bf16 (chunk, H)
            kv = jnp.dot(xb, wkv_ref[...],
                         preferred_element_type=jnp.float32) + bkv_ref[...]   # (chunk, 2H) f32
            k_sc[pl.ds(r0, kv_chunk), :] = kv[:, :hidden_size].astype(jnp.bfloat16)
            v_sc[pl.ds(r0, kv_chunk), :] = kv[:, hidden_size:].astype(jnp.bfloat16)

    # ---- Q projection for this query tile (x_tile also serves as the residual) ----
    x_tile = xq_ref[0]                                                    # (TQ, H) f32
    # 1/sqrt(H) is already folded into wq_ref / bq_ref (done once in the wrapper).
    q = jnp.dot(x_tile.astype(jnp.bfloat16), wq_ref[...],
                preferred_element_type=jnp.float32) + bq_ref[...]         # (TQ, H) f32

    # ---- scores: q @ k^T as an NT matmul (contract last dims; no in-kernel transpose) ----
    att = jax.lax.dot_general(q.astype(jnp.bfloat16), k_sc[...],
                              (((1,), (1,)), ((), ())),
                              preferred_element_type=jnp.float32)          # (TQ, S) f32

    # masked=False in EncoderAttention -> plain softmax (f32)
    m = jnp.max(att, axis=-1, keepdims=True)
    e = jnp.exp(att - m)
    denom = jnp.sum(e, axis=-1, keepdims=True)
    p = e * pl.reciprocal(denom, approx=True)                              # (TQ, S)

    # ---- attention output: p @ v ----
    attn_out = jnp.dot(p.astype(jnp.bfloat16), v_sc[...],
                       preferred_element_type=jnp.float32)                 # (TQ, H) f32

    # ---- residual add + LayerNorm (f32) ----
    y = x_tile + attn_out
    mu = jnp.mean(y, axis=-1, keepdims=True)
    yc = y - mu
    var = jnp.mean(yc * yc, axis=-1, keepdims=True)
    inv = jax.lax.rsqrt(var + eps)
    out_ref[0] = (yc * inv * gamma_ref[...] + beta_ref[...]).astype(out_ref.dtype)


def _pick_tq(seq_len):
    """Query-tile size: multiple of 128 dividing S, with ~2 MiB of live (TQ,S) f32
    softmax temporaries (att, e, p) so they stay resident without spill."""
    budget = 2 * 1024 * 1024
    for t in (512, 256, 128):
        if seq_len % t == 0 and 3 * t * seq_len * 4 <= budget:
            return t
    if seq_len > 128 and seq_len % 128 == 0:
        return 128
    return seq_len


def _pick_kv_chunk(seq_len):
    for t in (512, 256, 128):
        if seq_len % t == 0:
            return t
    return seq_len


def _vmem_limit_bytes():
    cap = 64 * 1024 * 1024
    try:
        cap = int(pltpu.get_tpu_info().vmem_capacity_bytes)
    except Exception:
        pass
    if cap >= 100 * 1024 * 1024:      # v5e / v6e: 128 MiB physical
        return 96 * 1024 * 1024
    return 48 * 1024 * 1024           # v7x: 64 MiB physical -> stay conservative


def encoder_attention(tok_ids, tok_emb, pos_emb, wq, bq, wk, bk, wv, bv,
                      gamma, beta, *, eps=1e-5):
    """EncoderAttention forward (eval mode). tok_ids: (B, S) int32 -> (B, S, H) f32."""
    B, S = tok_ids.shape
    H = tok_emb.shape[1]

    # Embedding lookup + positional embedding: data-dependent row gather, plain JAX.
    x = jnp.take(tok_emb, tok_ids, axis=0) + pos_emb[:S][None, :, :]      # (B, S, H) f32
    # TODO(synk): dropout(p=0.5) is identity in eval mode; train-mode (stateful RNG)
    # dropout is not implemented in-kernel.
    x_kv = x.astype(jnp.bfloat16)                                          # K/V-path copy

    # PyTorch nn.Linear weights are (out, in): pre-transpose ONCE in the wrapper, cast to
    # bf16, fold 1/sqrt(H) into the Q weights/bias, and fuse Wk|Wv into one wide matmul.
    scale = 1.0 / math.sqrt(H)
    wq_t = (wq.T * scale).astype(jnp.bfloat16)                             # (H, H)
    bq2 = (bq * scale).reshape(1, H)                                       # f32
    wkv_t = jnp.concatenate([wk.T, wv.T], axis=1).astype(jnp.bfloat16)     # (H, 2H)
    bkv2 = jnp.concatenate([bk, bv]).reshape(1, 2 * H)                     # f32
    gamma2 = gamma.reshape(1, H)
    beta2 = beta.reshape(1, H)

    tq = _pick_tq(S)
    n_q = S // tq
    kv_chunk = _pick_kv_chunk(S)

    kernel = partial(_encoder_attn_kernel, hidden_size=H, seq_len=S,
                     kv_chunk=kv_chunk, eps=eps)

    single = pl.Buffered(1)  # grid-invariant blocks: no second pipeline buffer
    w_spec = pl.BlockSpec((H, H), lambda b, q: (0, 0), pipeline_mode=single)
    wkv_spec = pl.BlockSpec((H, 2 * H), lambda b, q: (0, 0), pipeline_mode=single)
    vec_spec = pl.BlockSpec((1, H), lambda b, q: (0, 0), pipeline_mode=single)
    vec2_spec = pl.BlockSpec((1, 2 * H), lambda b, q: (0, 0), pipeline_mode=single)

    return pl.pallas_call(
        kernel,
        out_shape=jax.ShapeDtypeStruct((B, S, H), x.dtype),
        grid_spec=pltpu.PrefetchScalarGridSpec(
            num_scalar_prefetch=0,
            grid=(B, n_q),
            in_specs=[
                pl.BlockSpec((1, tq, H), lambda b, q: (b, q, 0)),          # x (f32): Q / residual tile
                pl.BlockSpec((1, S, H), lambda b, q: (b, 0, 0),            # x (bf16): K/V path, per-batch
                             pipeline_mode=single),
                w_spec, vec_spec,                                          # Wq^T*scale, bq*scale
                wkv_spec, vec2_spec,                                       # [Wk|Wv]^T, [bk|bv]
                vec_spec, vec_spec,                                        # gamma, beta
            ],
            out_specs=pl.BlockSpec((1, tq, H), lambda b, q: (b, q, 0)),
            scratch_shapes=[pltpu.VMEM((S, H), jnp.bfloat16),              # K cache (per batch elem)
                            pltpu.VMEM((S, H), jnp.bfloat16)],             # V cache (per batch elem)
        ),
        compiler_params=pltpu.CompilerParams(
            # q axis must stay innermost + "arbitrary": K/V scratch is carried across q-tiles.
            dimension_semantics=("parallel", "arbitrary"),
            vmem_limit_bytes=_vmem_limit_bytes(),
        ),
    )(x, x_kv, wq_t, bq2, wkv_t, bkv2, gamma2, beta2)


def _reference(tok_ids, tok_emb, pos_emb, wq, bq, wk, bk, wv, bv, gamma, beta, eps=1e-5):
    """Pure-JAX f32 reference mirroring the PyTorch EncoderAttention.forward (eval mode)."""
    S = tok_ids.shape[1]
    H = tok_emb.shape[1]
    x = tok_emb[tok_ids] + pos_emb[:S][None, :, :]
    q = jnp.einsum("bsh,oh->bso", x, wq) + bq
    k = jnp.einsum("bsh,oh->bso", x, wk) + bk
    v = jnp.einsum("bsh,oh->bso", x, wv) + bv
    att = jnp.einsum("bqh,bkh->bqk", q, k) / math.sqrt(H)
    p = jax.nn.softmax(att, axis=-1)
    attn_out = jnp.einsum("bqk,bkh->bqh", p, v)
    y = x + attn_out
    mu = y.mean(axis=-1, keepdims=True)
    var = ((y - mu) ** 2).mean(axis=-1, keepdims=True)
    return (y - mu) * jax.lax.rsqrt(var + eps) * gamma + beta


if __name__ == "__main__":
    B, S, H = 2, 8, 32
    vocab, max_len = 50, 16

    key = jax.random.PRNGKey(0)
    keys = jax.random.split(key, 10)

    tok_ids = jax.random.randint(keys[0], (B, S), 0, vocab, dtype=jnp.int32)
    tok_emb = jax.random.normal(keys[1], (vocab, H), dtype=jnp.float32)
    pos_emb = jax.random.normal(keys[2], (max_len, H), dtype=jnp.float32)

    bound = 1.0 / math.sqrt(H)
    wq = jax.random.uniform(keys[3], (H, H), minval=-bound, maxval=bound, dtype=jnp.float32)
    bq = jax.random.uniform(keys[4], (H,), minval=-bound, maxval=bound, dtype=jnp.float32)
    wk = jax.random.uniform(keys[5], (H, H), minval=-bound, maxval=bound, dtype=jnp.float32)
    bk = jax.random.uniform(keys[6], (H,), minval=-bound, maxval=bound, dtype=jnp.float32)
    wv = jax.random.uniform(keys[7], (H, H), minval=-bound, maxval=bound, dtype=jnp.float32)
    bv = jax.random.uniform(keys[8], (H,), minval=-bound, maxval=bound, dtype=jnp.float32)
    gamma = jnp.ones((H,), dtype=jnp.float32)
    beta = jnp.zeros((H,), dtype=jnp.float32)

    out = encoder_attention(tok_ids, tok_emb, pos_emb, wq, bq, wk, bk, wv, bv, gamma, beta)
    jax.block_until_ready(out)

    ref = _reference(tok_ids, tok_emb, pos_emb, wq, bq, wk, bk, wv, bv, gamma, beta)
    assert out.shape == (B, S, H)
    # bf16 MXU inputs + approx reciprocal -> compare with a bf16-appropriate tolerance.
    assert jnp.allclose(out, ref, atol=3e-2, rtol=3e-2), float(jnp.max(jnp.abs(out - ref)))

    print("KERNEL_OK")
</pallas_src>

<mosaic_0001>
module attributes {stable_mosaic.version = 11 : i64} {
  func.func @_encoder_attn_kernel(%arg0: i32, %arg1: i32, %arg2: memref<1x8x32xf32, #tpu.memory_space<vmem>>, %arg3: memref<1x8x32xbf16, #tpu.memory_space<vmem>>, %arg4: memref<32x32xbf16, #tpu.memory_space<vmem>>, %arg5: memref<1x32xf32, #tpu.memory_space<vmem>>, %arg6: memref<32x64xbf16, #tpu.memory_space<vmem>>, %arg7: memref<1x64xf32, #tpu.memory_space<vmem>>, %arg8: memref<1x32xf32, #tpu.memory_space<vmem>>, %arg9: memref<1x32xf32, #tpu.memory_space<vmem>>, %arg10: memref<1x8x32xf32, #tpu.memory_space<vmem>>, %arg11: memref<8x32xbf16, #tpu.memory_space<vmem>>, %arg12: memref<8x32xbf16, #tpu.memory_space<vmem>>) attributes {dimension_semantics = [#tpu.dimension_semantics<parallel>, #tpu.dimension_semantics<arbitrary>], iteration_bounds = array<i64: 2, 1>, scalar_prefetch = 0 : i64, scratch_operands = 2 : i64, tpu.core_type = #tpu.core_type<tc>, window_params = [{transform_indices = @transform_0, window_bounds = array<i64: 1, 8, 32>}, {pipeline_mode = #tpu.pipeline_mode<synchronous>, transform_indices = @transform_1, window_bounds = array<i64: 1, 8, 32>}, {pipeline_mode = #tpu.pipeline_mode<synchronous>, transform_indices = @transform_2, window_bounds = array<i64: 32, 32>}, {pipeline_mode = #tpu.pipeline_mode<synchronous>, transform_indices = @transform_3, window_bounds = array<i64: 1, 32>}, {pipeline_mode = #tpu.pipeline_mode<synchronous>, transform_indices = @transform_4, window_bounds = array<i64: 32, 64>}, {pipeline_mode = #tpu.pipeline_mode<synchronous>, transform_indices = @transform_5, window_bounds = array<i64: 1, 64>}, {pipeline_mode = #tpu.pipeline_mode<synchronous>, transform_indices = @transform_6, window_bounds = array<i64: 1, 32>}, {pipeline_mode = #tpu.pipeline_mode<synchronous>, transform_indices = @transform_7, window_bounds = array<i64: 1, 32>}, {transform_indices = @transform_8, window_bounds = array<i64: 1, 8, 32>}]} {
    %c0_i32 = arith.constant 0 : i32
    %0 = arith.cmpi eq, %arg1, %c0_i32 : i32
    %1 = arith.extui %0 : i1 to i32
    %c0_i32_0 = arith.constant 0 : i32
    %2 = arith.cmpi ne, %1, %c0_i32_0 : i32
    scf.if %2 {
      %c0_27 = arith.constant 0 : index
      %c0_28 = arith.constant 0 : index
      %c0_29 = arith.constant 0 : index
      %53 = vector.load %arg3[%c0_27, %c0_28, %c0_29] : memref<1x8x32xbf16, #tpu.memory_space<vmem>>, vector<1x8x32xbf16>
      %54 = vector.shape_cast %53 : vector<1x8x32xbf16> to vector<8x32xbf16>
      %c0_30 = arith.constant 0 : index
      %c0_31 = arith.constant 0 : index
      %55 = vector.load %arg6[%c0_30, %c0_31] : memref<32x64xbf16, #tpu.memory_space<vmem>>, vector<32x64xbf16>
      %cst_32 = arith.constant dense<0.000000e+00> : vector<8x64xf32>
      %56 = tpu.matmul %54, %55, %cst_32 {dimension_numbers = #tpu.dot_dimension_numbers<[1], [0], [0], [1], [0, 0, 1, 1], [], []>} : vector<8x32xbf16>, vector<32x64xbf16>, vector<8x64xf32> -> vector<8x64xf32>
      %c0_33 = arith.constant 0 : index
      %c0_34 = arith.constant 0 : index
      %57 = vector.load %arg7[%c0_33, %c0_34] : memref<1x64xf32, #tpu.memory_space<vmem>>, vector<1x64xf32>
      %58 = vector.broadcast %57 : vector<1x64xf32> to vector<8x64xf32>
      %59 = arith.addf %56, %58 : vector<8x64xf32>
      %60 = vector.extract_strided_slice %59 {offsets = [0, 0], sizes = [8, 32], strides = [1, 1]} : vector<8x64xf32> to vector<8x32xf32>
      %61 = arith.truncf %60 : vector<8x32xf32> to vector<8x32xbf16>
      %c0_35 = arith.constant 0 : index
      %c0_36 = arith.constant 0 : index
      %62 = vector.load %arg11[%c0_35, %c0_36] : memref<8x32xbf16, #tpu.memory_space<vmem>>, vector<8x32xbf16>
      tpu.vector_store %arg11[%c0_35, %c0_36], %61 {strides = array<i32>} : memref<8x32xbf16, #tpu.memory_space<vmem>>, vector<8x32xbf16>,
      %63 = vector.extract_strided_slice %59 {offsets = [0, 32], sizes = [8, 32], strides = [1, 1]} : vector<8x64xf32> to vector<8x32xf32>
      %64 = arith.truncf %63 : vector<8x32xf32> to vector<8x32xbf16>
      %c0_37 = arith.constant 0 : index
      %c0_38 = arith.constant 0 : index
      %65 = vector.load %arg12[%c0_37, %c0_38] : memref<8x32xbf16, #tpu.memory_space<vmem>>, vector<8x32xbf16>
      tpu.vector_store %arg12[%c0_37, %c0_38], %64 {strides = array<i32>} : memref<8x32xbf16, #tpu.memory_space<vmem>>, vector<8x32xbf16>,
    } else {
    }
    %c0 = arith.constant 0 : index
    %c0_1 = arith.constant 0 : index
    %c0_2 = arith.constant 0 : index
    %3 = vector.load %arg2[%c0, %c0_1, %c0_2] : memref<1x8x32xf32, #tpu.memory_space<vmem>>, vector<1x8x32xf32>
    %4 = vector.shape_cast %3 : vector<1x8x32xf32> to vector<8x32xf32>
    %5 = arith.truncf %4 : vector<8x32xf32> to vector<8x32xbf16>
    %c0_3 = arith.constant 0 : index
    %c0_4 = arith.constant 0 : index
    %6 = vector.load %arg4[%c0_3, %c0_4] : memref<32x32xbf16, #tpu.memory_space<vmem>>, vector<32x32xbf16>
    %cst = arith.constant dense<0.000000e+00> : vector<8x32xf32>
    %7 = tpu.matmul %5, %6, %cst {dimension_numbers = #tpu.dot_dimension_numbers<[1], [0], [0], [1], [0, 0, 1, 1], [], []>} : vector<8x32xbf16>, vector<32x32xbf16>, vector<8x32xf32> -> vector<8x32xf32>
    %c0_5 = arith.constant 0 : index
    %c0_6 = arith.constant 0 : index
    %8 = vector.load %arg5[%c0_5, %c0_6] : memref<1x32xf32, #tpu.memory_space<vmem>>, vector<1x32xf32>
    %9 = vector.broadcast %8 : vector<1x32xf32> to vector<8x32xf32>
    %10 = arith.addf %7, %9 : vector<8x32xf32>
    %11 = arith.truncf %10 : vector<8x32xf32> to vector<8x32xbf16>
    %c0_7 = arith.constant 0 : index
    %c0_8 = arith.constant 0 : index
    %12 = vector.load %arg11[%c0_7, %c0_8] : memref<8x32xbf16, #tpu.memory_space<vmem>>, vector<8x32xbf16>
    %cst_9 = arith.constant dense<0.000000e+00> : vector<8x8xf32>
    %13 = tpu.matmul %11, %12, %cst_9 {dimension_numbers = #tpu.dot_dimension_numbers<[1], [1], [0], [0], [0, 0, 1, 0], [], []>} : vector<8x32xbf16>, vector<8x32xbf16>, vector<8x8xf32> -> vector<8x8xf32>
    %cst_10 = arith.constant dense<0xFF800000> : vector<8xf32>
    %14 = vector.multi_reduction <maximumf>, %13, %cst_10 [1] : vector<8x8xf32> to vector<8xf32>
    %15 = vector.shape_cast %14 : vector<8xf32> to vector<8x1xf32>
    %16 = vector.broadcast %15 : vector<8x1xf32> to vector<8x8xf32>
    %17 = arith.subf %13, %16 : vector<8x8xf32>
    %18 = math.exp %17 : vector<8x8xf32>
    %cst_11 = arith.constant dense<0.000000e+00> : vector<8xf32>
    %19 = vector.multi_reduction <add>, %18, %cst_11 [1] : vector<8x8xf32> to vector<8xf32>
    %20 = vector.shape_cast %19 : vector<8xf32> to vector<8x1xf32>
    %21 = tpu.reciprocal %20 {approx = true} : vector<8x1xf32> -> vector<8x1xf32>
    %22 = vector.broadcast %21 : vector<8x1xf32> to vector<8x8xf32>
    %23 = arith.mulf %18, %22 : vector<8x8xf32>
    %24 = arith.truncf %23 : vector<8x8xf32> to vector<8x8xbf16>
    %c0_12 = arith.constant 0 : index
    %c0_13 = arith.constant 0 : index
    %25 = vector.load %arg12[%c0_12, %c0_13] : memref<8x32xbf16, #tpu.memory_space<vmem>>, vector<8x32xbf16>
    %cst_14 = arith.constant dense<0.000000e+00> : vector<8x32xf32>
    %26 = tpu.matmul %24, %25, %cst_14 {dimension_numbers = #tpu.dot_dimension_numbers<[1], [0], [0], [1], [0, 0, 1, 1], [], []>} : vector<8x8xbf16>, vector<8x32xbf16>, vector<8x32xf32> -> vector<8x32xf32>
    %27 = arith.addf %4, %26 : vector<8x32xf32>
    %cst_15 = arith.constant dense<0.000000e+00> : vector<8xf32>
    %28 = vector.multi_reduction <add>, %27, %cst_15 [1] : vector<8x32xf32> to vector<8xf32>
    %29 = vector.shape_cast %28 : vector<8xf32> to vector<8x1xf32>
    %cst_16 = arith.constant 3.200000e+01 : f32
    %30 = vector.broadcast %cst_16 : f32 to vector<8x1xf32>
    %31 = arith.divf %29, %30 : vector<8x1xf32>
    %32 = vector.broadcast %31 : vector<8x1xf32> to vector<8x32xf32>
    %33 = arith.subf %27, %32 : vector<8x32xf32>
    %34 = arith.mulf %33, %33 : vector<8x32xf32>
    %cst_17 = arith.constant dense<0.000000e+00> : vector<8xf32>
    %35 = vector.multi_reduction <add>, %34, %cst_17 [1] : vector<8x32xf32> to vector<8xf32>
    %36 = vector.shape_cast %35 : vector<8xf32> to vector<8x1xf32>
    %cst_18 = arith.constant 3.200000e+01 : f32
    %37 = vector.broadcast %cst_18 : f32 to vector<8x1xf32>
    %38 = arith.divf %36, %37 : vector<8x1xf32>
    %cst_19 = arith.constant 9.99999974E-6 : f32
    %39 = vector.broadcast %cst_19 : f32 to vector<8x1xf32>
    %40 = arith.addf %38, %39 : vector<8x1xf32>
    %41 = math.rsqrt %40 : vector<8x1xf32>
    %42 = vector.broadcast %41 : vector<8x1xf32> to vector<8x32xf32>
    %43 = arith.mulf %33, %42 : vector<8x32xf32>
    %c0_20 = arith.constant 0 : index
    %c0_21 = arith.constant 0 : index
    %44 = vector.load %arg8[%c0_20, %c0_21] : memref<1x32xf32, #tpu.memory_space<vmem>>, vector<1x32xf32>
    %45 = vector.broadcast %44 : vector<1x32xf32> to vector<8x32xf32>
    %46 = arith.mulf %43, %45 : vector<8x32xf32>
    %c0_22 = arith.constant 0 : index
    %c0_23 = arith.constant 0 : index
    %47 = vector.load %arg9[%c0_22, %c0_23] : memref<1x32xf32, #tpu.memory_space<vmem>>, vector<1x32xf32>
    %48 = vector.broadcast %47 : vector<1x32xf32> to vector<8x32xf32>
    %49 = arith.addf %46, %48 : vector<8x32xf32>
    %c0_24 = arith.constant 0 : index
    %c0_25 = arith.constant 0 : index
    %c0_26 = arith.constant 0 : index
    %50 = vector.load %arg10[%c0_24, %c0_25, %c0_26] : memref<1x8x32xf32, #tpu.memory_space<vmem>>, vector<1x8x32xf32>
    %51 = vector.shape_cast %50 : vector<1x8x32xf32> to vector<8x32xf32>
    %52 = vector.shape_cast %49 : vector<8x32xf32> to vector<1x8x32xf32>
    tpu.vector_store %arg10[%c0_24, %c0_25, %c0_26], %52 {strides = array<i32>} : memref<1x8x32xf32, #tpu.memory_space<vmem>>, vector<1x8x32xf32>,
    return
  }
  func.func @transform_0(%arg0: i32, %arg1: i32) -> (i32, i32, i32) {
    %c0_i32 = arith.constant 0 : i32
    %c0_i32_0 = arith.constant 0 : i32
    return %arg0, %arg1, %c0_i32 : i32, i32, i32
  }
  func.func @transform_1(%arg0: i32, %arg1: i32) -> (i32, i32, i32) {
    %c0_i32 = arith.constant 0 : i32
    %c0_i32_0 = arith.constant 0 : i32
    %c0_i32_1 = arith.constant 0 : i32
    return %arg0, %c0_i32, %c0_i32_0 : i32, i32, i32
  }
  func.func @transform_2(%arg0: i32, %arg1: i32) -> (i32, i32) {
    %c0_i32 = arith.constant 0 : i32
    %c0_i32_0 = arith.constant 0 : i32
    %c0_i32_1 = arith.constant 0 : i32
    return %c0_i32, %c0_i32_0 : i32, i32
  }
  func.func @transform_3(%arg0: i32, %arg1: i32) -> (i32, i32) {
    %c0_i32 = arith.constant 0 : i32
    %c0_i32_0 = arith.constant 0 : i32
    %c0_i32_1 = arith.constant 0 : i32
    return %c0_i32, %c0_i32_0 : i32, i32
  }
  func.func @transform_4(%arg0: i32, %arg1: i32) -> (i32, i32) {
    %c0_i32 = arith.constant 0 : i32
    %c0_i32_0 = arith.constant 0 : i32
    %c0_i32_1 = arith.constant 0 : i32
    return %c0_i32, %c0_i32_0 : i32, i32
  }
  func.func @transform_5(%arg0: i32, %arg1: i32) -> (i32, i32) {
    %c0_i32 = arith.constant 0 : i32
    %c0_i32_0 = arith.constant 0 : i32
    %c0_i32_1 = arith.constant 0 : i32
    return %c0_i32, %c0_i32_0 : i32, i32
  }
  func.func @transform_6(%arg0: i32, %arg1: i32) -> (i32, i32) {
    %c0_i32 = arith.constant 0 : i32
    %c0_i32_0 = arith.constant 0 : i32
    %c0_i32_1 = arith.constant 0 : i32
    return %c0_i32, %c0_i32_0 : i32, i32
  }
  func.func @transform_7(%arg0: i32, %arg1: i32) -> (i32, i32) {
    %c0_i32 = arith.constant 0 : i32
    %c0_i32_0 = arith.constant 0 : i32
    %c0_i32_1 = arith.constant 0 : i32
    return %c0_i32, %c0_i32_0 : i32, i32
  }
  func.func @transform_8(%arg0: i32, %arg1: i32) -> (i32, i32, i32) {
    %c0_i32 = arith.constant 0 : i32
    %c0_i32_0 = arith.constant 0 : i32
    return %arg0, %arg1, %c0_i32 : i32, i32, i32
  }
}

</mosaic_0001>

<bundles_post_ra>
// kernel: tpu_custom_call.1
= control target key start
LH: loop header
LB: loop body
LE: loop exit
PB: predicated region body
PF: predicated region fallthrough
CT: control target
= control target key end

     0   :  { %s1560_s0 = inlined_call_operand.hbm [shape: f32[2,8,32], index: 0, kind: input, shape index: {}]   ;;  %s1561_s1 = inlined_call_operand.hbm [shape: bf16[2,8,32], index: 1, kind: input, shape index: {}]   ;;  %s1562_s2 = inlined_call_operand.hbm [shape: bf16[32,32], index: 2, kind: input, shape index: {}]   ;;  %s1563_s3 = inlined_call_operand.vmem [shape: f32[1,32], index: 3, kind: input, shape index: {}]   ;;  %s1564_s4 = inlined_call_operand.hbm [shape: bf16[32,64], index: 4, kind: input, shape index: {}]   ;;  %s1565_s5 = inlined_call_operand.vmem [shape: f32[1,64], index: 5, kind: input, shape index: {}]   ;;  %s1566_s6 = inlined_call_operand.vmem [shape: f32[1,32], index: 6, kind: input, shape index: {}]   ;;  %s1567_s7 = inlined_call_operand.vmem [shape: f32[1,32], index: 7, kind: input, shape index: {}]   ;;  %s1568_s8 = inlined_call_operand.hbm [shape: f32[2,8,32], index: 8, kind: output, shape index: {}]  }
   0x1   :  { %1578 = sst [smem:[#allocation20_spill]] %s1561_s1 }
   0x2   :  { %1579 = sst [smem:[#allocation21_spill]] %s1568_s8 }
   0x3   :  { %13 = vsyncpa [#allocation5], 0 }
   0x4   :  { %15 = vsyncpa [#allocation5 + $0x1], 0 }
   0x5   :  { %16 = vsyncpa [#allocation8], 0 }
   0x6   :  { %17 = vsyncpa [#allocation11], 0 }
   0x7   :  { %18 = vsyncpa [#allocation6], 0 }
   0x8   :  { %20 = vsyncpa [#allocation6 + $0x1], 0  ;;  %s1247_s27 = smov 0   ;;  %s1249_s28 = smov 0  }
   0x9   :  { %s1251_s29 = smov 0   ;;  %s1253_s30 = smov 0  }
   0xa   :  { %s1255_s9 = smov 0   ;;  %s1257_s10 = smov 0  }
   0xb LB: > { %1580 = sst [smem:[#allocation18_spill]] %s1170_s27  ;;  %s806_s11 = sadd.s32 4294967295, %s1190_s10   ;;  %s1190_s10 = sphi %s1257_s10, %s26_s10   ;;  %s1186_s9 = sphi %s1255_s9, %s1607_s9   ;;  %s1182_s30 = sphi %s1253_s30, %s1606_s30   ;;  %s1178_s29 = sphi %s1251_s29, %s1605_s29   ;;  %s1174_s28 = sphi %s1249_s28, %s1604_s28   ;;  %s1170_s27 = sphi %s1247_s27, %s1603_s27  }
   0xc   : > { %s807_s12 = sadd.s32 4294967294, %s1190_s10   ;;  %p60_p0 = scmp.ne.s32.totalorder %s1174_s28, %s1170_s27 }
   0xd   : > { %p1281_p1 = scmp.eq.s32.totalorder %s806_s11, 0  ;;  %p1285_p2 = scmp.eq.s32.totalorder %s806_s11, 1 }
   0xe   : > { %p244_p3 = scmp.eq.s32.totalorder %s807_s12, 1  ;;  %p808_p5 = scmp.ge.s32.totalorder %s1190_s10, 1 }
   0xf   : > { %s1581_s13 = scalar_select %p1281_p1, 1, 0 }
  0x10   : > { %s1582_s14 = scalar_select %p1285_p2, 1, 0 }
  0x11   : > { %p1291_p4 = por %p1281_p1, %p60_p0  ;;  %p1296_p6 = por %p244_p3, %p60_p0 }
  0x12   : > { %p251_p7 = scmp.lt.s32.totalorder %s1190_s10, 3  ;;  %s809_s17 = sshll.u32 %s1182_s30, 6 }
  0x13   : > { %s1583_s15 = scalar_select %p1291_p4, 1, 0 }
  0x14   : > { %s1584_s16 = scalar_select %p1296_p6, 1, 0 }
  0x15   : > { %p1302_p8 = pnand %p808_p5, %p251_p7  ;;  %s1587_s1 = sld [smem:[#allocation20_spill]] }
  0x16   : > { %1585 = sst [smem:[#allocation19_spill]] %s1584_s16  ;;  %s1192_s22 = smov [#allocation7]  }
  0x17   : > { %s1586_s18 = scalar_select %p1302_p8, 1, 0 }
  0x18   : > { %s266_s23 = sshll.u32 %s1192_s22, 4  ;;  %p890_p9 = pneg %p1302_p8  ;;  %s267_s23 = int_to_ptr.vmem [resolvable:$true] %s266_s23 }
  0x19   : > { %s1193_s26 = smov [#allocation9]  }
  0x1a   : > { %p1316_p11 = pnand %p890_p9, %p1291_p4  ;;  %p1322_p12 = pnand %p890_p9, %p1281_p1 }
  0x1b   : > { %s1309_s21 = scalar_lea.hbm %s1587_s1, %s809_s17  ;;  %s276_s11 = sshll.u32 %s1193_s26, 4  ;;  %s277_s11 = int_to_ptr.vmem [resolvable:$true] %s276_s11 }
  0x1c   : > { %s1589_s25 = scalar_select %p1322_p12, 1, 0 }
  0x1d   : > { %s980_s12 = scalar_lea.hbm %s1309_s21, 64  ;;  %p982_p0 = pneg %p1316_p11 }
  0x1e   : > { %p981_p13 = scmp.ne.s32.totalorder %s1309_s21, %s980_s12  ;;  %s985_s20 = scalar_lea.hbm %s1587_s1, 128 }
  0x1f   : > { %p986_p7 = scmp.lt.u32.totalorder %s1309_s21, %s1587_s1  ;;  %p987_p9 = scmp.lt.u32.totalorder %s985_s20, %s980_s12 }
  0x20   : > { %p983_p3 = pnand %p982_p0, %p981_p13  ;;  %p989_p6 = scmp.lt.u32.totalorder %s980_s12, %s1309_s21 }
  0x21   : > { %p988_p10 = por %p987_p9, %p986_p7 }
  0x22   : > { %p984_p5 = pneg %p983_p3 }
  0x23   : > { %p990_p1 = por %p989_p6, %p988_p10 }
  0x25   : > { %p991_p4 = pnand %p990_p1, %p984_p5 }
  0x27   : > { %994 = shalt.err (!%p991_p4)
}
  0x28   : > { %s995_s26 = scalar_lea.vmem %s267_s23, 64  ;;  %p1003_p2 = scmp.lt.s32.totalorder %s267_s23, %s267_s23 }
  0x29   : > { %p996_p8 = scmp.ne.s32.totalorder %s267_s23, %s995_s26  ;;  %p1004_p12 = scmp.lt.s32.totalorder %s995_s26, %s995_s26 }
  0x2b   : > { %p998_p13 = pnand %p996_p8, %p982_p0  ;;  %p1005_p7 = por %p1004_p12, %p1003_p2 }
  0x2d   : > { %p999_p3 = pneg %p998_p13 }
  0x2f   : > { %p1006_p9 = pnand %p1005_p7, %p999_p3 }
  0x31   : > { %1009 = shalt.err (!%p1006_p9)
}
  0x32   : > { %893 = dma.hbm_to_vmem [thread:$0]  (!%p1316_p11), %s1309_s21, 64, %s267_s23, [#allocation8]  }
  0x33   : > { %s1010_s17 = scalar_lea.hbm %s1562_s2, 256  ;;  %p1590_p4 = scmp.ne.s32.totalorder %s1589_s25, 0 }
  0x34   : > { %p1011_p1 = scmp.ne.s32.totalorder %s1562_s2, %s1010_s17  ;;  %p1017_p10 = scmp.lt.u32.totalorder %s1010_s17, %s1562_s2 }
  0x35   : > { %p1012_p6 = pneg %p1590_p4 }
  0x37   : > { %p1013_p2 = pnand %p1012_p6, %p1011_p1 }
  0x39   : > { %p1014_p8 = pneg %p1013_p2 }
  0x3b   : > { %p1019_p11 = pnand %p1017_p10, %p1014_p8 }
  0x3d   : > { %1022 = shalt.err (!%p1019_p11)
}
  0x3e   : > { %s1023_s21 = scalar_lea.vmem %s277_s11, 256  ;;  %p1031_p13 = scmp.lt.s32.totalorder %s277_s11, %s277_s11 }
  0x3f   : > { %p1024_p12 = scmp.ne.s32.totalorder %s277_s11, %s1023_s21  ;;  %p1032_p3 = scmp.lt.s32.totalorder %s1023_s21, %s1023_s21 }
  0x41   : > { %p1026_p0 = pnand %p1024_p12, %p1012_p6  ;;  %p1033_p7 = por %p1032_p3, %p1031_p13 }
  0x43   : > { %p1027_p5 = pneg %p1026_p0 }
  0x45   : > { %p1034_p9 = pnand %p1033_p7, %p1027_p5 }
  0x47   : > { %1037 = shalt.err (!%p1034_p9)
}
  0x48   : > { %s1194_s23 = smov 64   ;;  %s1195_s26 = smov 4  }
  0x49   : > { %896 = dma.hbm_to_vmem [thread:$0]  (!%p1590_p4), %s1562_s2, 256, %s277_s11, [#allocation8], %s1194_s23, %s1194_s23, %s1195_s26  }
  0x4a   : > { %s1196_s17 = smov [#allocation10]   ;;  %s1038_s22 = scalar_lea.hbm %s1564_s4, 256 }
  0x4b   : > { %s292_s19 = sshll.u32 %s1196_s17, 4  ;;  %p1039_p1 = scmp.ne.s32.totalorder %s1564_s4, %s1038_s22  ;;  %s293_s19 = int_to_ptr.vmem [resolvable:$true] %s292_s19 }
  0x4c   : > { %p1045_p10 = scmp.lt.u32.totalorder %s1038_s22, %s1564_s4 }
  0x4d   : > { %p1041_p2 = pnand %p1039_p1, %p1012_p6 }
  0x4f   : > { %p1042_p8 = pneg %p1041_p2 }
  0x51   : > { %p1047_p11 = pnand %p1045_p10, %p1042_p8 }
  0x53   : > { %1050 = shalt.err (!%p1047_p11)
}
  0x54   : > { %s1051_s11 = scalar_lea.vmem %s293_s19, 256  ;;  %p1059_p13 = scmp.lt.s32.totalorder %s293_s19, %s293_s19 }
  0x55   : > { %p1052_p12 = scmp.ne.s32.totalorder %s293_s19, %s1051_s11  ;;  %p1060_p3 = scmp.lt.s32.totalorder %s1051_s11, %s1051_s11 }
  0x57   : > { %p1054_p0 = pnand %p1052_p12, %p1012_p6  ;;  %p1061_p7 = por %p1060_p3, %p1059_p13 }
  0x59   : > { %p1055_p5 = pneg %p1054_p0 }
  0x5b   : > { %p1062_p9 = pnand %p1061_p7, %p1055_p5 }
  0x5d   : > { %1065 = shalt.err (!%p1062_p9)
}
  0x5e   : > { %899 = dma.hbm_to_vmem [thread:$0]  (!%p1590_p4), %s1564_s4, 256, %s293_s19, [#allocation11], %s1194_s23, %s1194_s23, %s1195_s26  }
  0x5f   : > { %s38_s8 = sadd.s32 1, %s1186_s9  ;;  %s47_s27 = sadd.s32 1, %s1178_s29 }
  0x60   : > { %p40_p6 = scmp.ge.s32.totalorder %s38_s8, 2  ;;  %p54_p1 = scmp.ne.s32.totalorder %s1178_s29, %s1174_s28 }
  0x61   : > { %p55_p2 = scmp.eq.s32.totalorder %s1190_s10, 0  ;;  %p1592_p10 = scmp.ne.s32.totalorder %s1582_s14, 0 }
  0x62   : > { %s1609_s8 = smov (%p40_p6, %s38_s8), 0  ;;  %p910_p4 = scmp.lt.s32.totalorder %s1190_s10, 2 }
  0x63   : > { %p1396_p8 = por %p55_p2, %p54_p1  ;;  %p1402_p11 = por %p1592_p10, %p54_p1 }
  0x64   : > { %s42_s17 = ssub.s32 %s1186_s9, %s1609_s8  ;;  %s315_s23 = sand.u32 1, %s1178_s29  }
  0x65   : > { %p45_p12 = scmp.eq.s32.totalorder %s42_s17, 0  ;;  %s813_s26 = sshll.u32 %s315_s23, 3 }
  0x66   : > { %s814_s20 = sshll.u32 %s1186_s9, 7  ;;  %s319_s14 = scalar_lea.vmem [#allocation4], %s813_s26 }
  0x67   : > { %s1411_s19 = scalar_select %p45_p12, %s1178_s29, %s47_s27  }
  0x68   : > { %s1417_s21 = scalar_lea.hbm %s1560_s0, %s814_s20  ;;  %s327_s11 = sshll.u32 %s319_s14, 4  ;;  %s1419_s11 = int_to_ptr.vmem [resolvable:$true] %s327_s11 }
  0x69   : > { %p1423_p0 = pnand %p910_p4, %p1396_p8  ;;  %s316_s16 = scalar_lea.sflag [#allocation5], %s315_s23 }
  0x6a   : > { %s1066_s27 = scalar_lea.hbm %s1417_s21, 128  ;;  %s1071_s20 = scalar_lea.hbm %s1560_s0, 256 }
  0x6b   : > { %p1067_p5 = scmp.ne.s32.totalorder %s1417_s21, %s1066_s27  ;;  %p1068_p13 = pneg %p1423_p0 }
  0x6c   : > { %p1072_p9 = scmp.lt.u32.totalorder %s1417_s21, %s1560_s0  ;;  %p1073_p6 = scmp.lt.u32.totalorder %s1071_s20, %s1066_s27 }
  0x6d   : > { %p1069_p3 = pnand %p1068_p13, %p1067_p5  ;;  %p1075_p2 = scmp.lt.u32.totalorder %s1066_s27, %s1417_s21 }
  0x6e   : > { %p1074_p1 = por %p1073_p6, %p1072_p9 }
  0x6f   : > { %p1070_p7 = pneg %p1069_p3 }
  0x70   : > { %p1076_p8 = por %p1075_p2, %p1074_p1 }
  0x72   : > { %p1077_p10 = pnand %p1076_p8, %p1070_p7 }
  0x74   : > { %1080 = shalt.err (!%p1077_p10)
}
  0x75   : > { %s1081_s23 = scalar_lea.vmem %s1419_s11, 128  ;;  %s1197_s22 = smov [#allocation4]  }
  0x76   : > { %p1082_p4 = scmp.ne.s32.totalorder %s1419_s11, %s1081_s23  ;;  %s1086_s14 = sshll.u32 %s1197_s22, 4  ;;  %s1087_s14 = int_to_ptr.vmem [resolvable:$false] %s1086_s14 }
  0x77   : > { %s1088_s17 = scalar_lea.vmem %s1087_s14, 256  ;;  %p1089_p3 = scmp.lt.s32.totalorder %s1419_s11, %s1087_s14 }
  0x78   : > { %p1084_p12 = pnand %p1082_p4, %p1068_p13  ;;  %p1090_p9 = scmp.lt.s32.totalorder %s1088_s17, %s1081_s23 }
  0x7a   : > { %p1085_p5 = pneg %p1084_p12  ;;  %p1091_p6 = por %p1090_p9, %p1089_p3 }
  0x7c   : > { %p1092_p1 = pnand %p1091_p6, %p1085_p5 }
  0x7e   : > { %1095 = shalt.err (!%p1092_p1)
}
  0x7f   : > { %903 = dma.hbm_to_vmem [thread:$0]  (!%p1423_p0), %s1417_s21, 128, %s1419_s11, %s316_s16  }
  0x80   : > { %p1595_p7 = scmp.ne.s32.totalorder %s1586_s18, 0 }
  0x81   : > { %s1455_s27 = sand.u32 (!%p1595_p7), 1, %s1174_s28   ;;  %p1596_p13 = scmp.ne.s32.totalorder (!%p1595_p7), %s1583_s15, 0 }
  0x82   : > { %336 = sbr.rel (%p1595_p7) target bundleno = 1456 (0x5b0), region = 52  ;;  %s816_s26 = sshll.u32 (!%p1595_p7), %s1455_s27, 3 }
  0x83   : > { %s339_s20 = scalar_lea.sflag (!%p1595_p7), [#allocation5], %s1455_s27  ;;  %s342_s25 = scalar_lea.vmem (!%p1595_p7), [#allocation4], %s816_s26 }
  0x89   : > { %1149 = dma.done.wait (%p1596_p13), %s339_s20, 128  }
  0x8a   : > { %1151 = vsyncadd (%p1596_p13), %s339_s20, 4294967168 }
  0x8b   : > { %1153 = dma.done.wait (%p1596_p13), [#allocation8], 64  }
  0x8c   : > { %1155 = vsyncadd (%p1596_p13), [#allocation8], 4294967232  ;;  %p1597_p0 = scmp.ne.s32.totalorder %s1581_s13, 0 }
  0x8e   : > { %1157 = dma.done.wait (%p1597_p0), [#allocation8], 256  }
  0x8f   : > { %1159 = vsyncadd (%p1597_p0), [#allocation8], 4294967040 }
  0x90   : > { %1161 = dma.done.wait (%p1597_p0), [#allocation11], 256  }
  0x91   : > { %1163 = vsyncadd (%p1597_p0), [#allocation11], 4294967040  ;;  %v1198_v0 = vmov 0.0   ;;  %vm1199_vm0 = vmmov 0   ;;  %v970_v1 = vld [vmem:[#allocation10] sm:$0xff]   ;;  %v971_v2 = vld [vmem:[#allocation10 + $0x8] sm:$0xff]  }
  0x92   : > { %848 = vmatprep.subr.bf16.mxu0 %v1198_v0  ;;  %852 = vmatprep.mubr.msk.bf16.mxu0 %vm1199_vm0, %v1198_v0  ;;  %v972_v3 = vld [vmem:[#allocation9] sm:$0xff]   ;;  %v973_v4 = vld [vmem:[#allocation9 + $0x8] sm:$0xff]   ;;  %v392_v6 = vld [vmem:[#allocation7] sm:$0xf]  ;;  %vm416_vm1 = vcmask 261120   ;;  %vm461_vm2 = vcmask 257024  }
  0x93   : > { %856 = vmatprep.subr.bf16.mxu1 %v1198_v0  ;;  %860 = vmatprep.mubr.msk.bf16.mxu1 %vm1199_vm0, %v1198_v0  ;;  %v470_v5 = vld [vmem:[%s342_s25] sm:$0xff]  ;;  %v820_v8 = vld [vmem:[%s1565_s5] ss:$0 sm:$0xff]  ;;  %s1200_s18 = smov 96   ;;  %vm604_vm3 = vcmask 1043456   ;;  %vm587_vm4 = vcmask 64512  }
  0x94   : > { %849 = vmatpush3.bf16.msra.mxu0 %v970_v1  ;;  %857 = vmatpush3.bf16.msra.mxu1 %v972_v3  ;;  %v471_v7 = vpack.c.bf16 %v470_v5, %v470_v5  ;;  %v825_v19 = vld [vmem:[%s1563_s3] ss:$0 sm:$0xff]  ;;  %s834_s22 = sshll.u32 %s1182_s30, 7  ;;  %s386_s14 = scalar_lea.vmem [#allocation12], %s816_s26 }
  0x95   : > { %850 = vmatprep.subr.bf16.mxu0 %v1198_v0  ;;  %858 = vmatprep.subr.bf16.mxu1 %v1198_v0  ;;  %v831_v56 = vld [vmem:[%s1566_s6] ss:$0 sm:$0xff]  ;;  %s695_s17 = sshll.u32 %s386_s14, 4  ;;  %s1598_s13 = sld [smem:[#allocation21_spill]]  ;;  %s1512_s17 = int_to_ptr.vmem [resolvable:$true] %s695_s17 }
  0x96   : > { %v832_v58 = vld [vmem:[%s1567_s7] ss:$0 sm:$0xff]  ;;  %s1096_s21 = scalar_lea.vmem %s1512_s17, 128  ;;  %s1201_s30 = smov [#allocation12]  }
  0x97   : > { %p1097_p2 = scmp.ne.s32.totalorder %s1512_s17, %s1096_s21  ;;  %s1100_s26 = sshll.u32 %s1201_s30, 4  ;;  %s1101_s26 = int_to_ptr.vmem [resolvable:$false] %s1100_s26 }
  0x98   : > { %851 = vmatpush3.bf16.msra.mxu0 %v971_v2  ;;  %859 = vmatpush3.bf16.msra.mxu1 %v973_v4  ;;  %s1102_s11 = scalar_lea.vmem %s1101_s26, 256  ;;  %p1103_p4 = scmp.lt.s32.totalorder %s1512_s17, %s1101_s26 }
  0x99   : > { %864 = vmatprep.subr.bf16.mxu0 %v1198_v0  ;;  %870 = vmatprep.subr.bf16.mxu1 %v1198_v0  ;;  %p1098_p8 = pnand %p1097_p2, %p1402_p11  ;;  %p1104_p12 = scmp.lt.s32.totalorder %s1102_s11, %s1096_s21 }
  0x9b   : > { %853 = vmatmul.mubr.msk.bf16.vlgmr.msra.gmra.mrb[0].mxu0 %vm416_vm1, %v392_v6  ;;  %861 = vmatmul.mubr.msk.bf16.vlgmr.msra.gmra.mrb[0].mxu1 %vm416_vm1, %v471_v7  ;;  %s1510_s15 = scalar_lea.hbm %s1598_s13, %s834_s22  ;;  %p1099_p10 = pneg %p1098_p8 }
  0x9c   : > { %866 = vmatprep.mubr.msk.bf16.mxu0 %vm1199_vm0, %v1198_v0  ;;  %872 = vmatprep.mubr.msk.bf16.mxu1 %vm1199_vm0, %v1198_v0  ;;  %p1105_p5 = por %p1104_p12, %p1103_p4 }
  0x9e   : > { %p1106_p3 = pnand %p1105_p5, %p1099_p10 }
 0x16e   : > { %v454_v9 = vpop.f32.mrb[0].mxu0  ;;  %v533_v15 = vpop.f32.mrb[0].mxu1 }
 0x16f   : > { %v455_v10 = vadd.f32 %v820_v8, %v454_v9  ;;  %v854_v11 = vpop.f32.mrb[1].mxu0  ;;  %v862_v16 = vpop.f32.mrb[1].mxu1  ;;  %v534_v21 = vadd.f32 %v825_v19, %v533_v15 }
 0x170   : > { %v457_v12 = vpop.f32.mrb[2].mxu0  ;;  %v536_v17 = vpop.f32.mrb[2].mxu1 }
 0x171   : > { %v460_v13 = vpack.c.bf16 %v455_v10, %v455_v10  ;;  %v855_v14 = vpop.f32.mrb[3].mxu0  ;;  %v863_v18 = vpop.f32.mrb[3].mxu1  ;;  %v539_v23 = vpack.c.bf16 %v534_v21, %v534_v21 }
 0x173   : > { %462 = vst.msk [vmem:[#allocation2] sm:$0xf] %vm461_vm2, %v460_v13  ;;  %466 = vrot.lane.b32.xlu1 %v460_v13, %s1200_s18  ;;  %s681_s18 = scalar_lea.sflag [#allocation6], %s1455_s27 }
 0x17a   : > { %v540_v20 = vld [vmem:[#allocation2] sm:$0xf] }
 0x17b   : > { %v545_v22 = vsel %vm416_vm1, %v540_v20, 0 }
 0x17c   : > { %865 = vmatpush3.bf16.xpose.msra.mxu0 %v545_v22 }
 0x183   : > { %867 = vmatmul.mubr.msk.bf16.vlgmr.msra.gmra.mrb[4].mxu0 %vm416_vm1, %v539_v23 }
 0x1e5   : > { %v467_v24 = vpop.permute.xlu1 %466 }
 0x1e6   : > { %469 = vst.msk [vmem:[#allocation3] sm:$0xf] %vm461_vm2, %v467_v24 }
 0x1ed   : > { %v600_v25 = vld [vmem:[#allocation3] sm:$0xf] }
 0x1ee   : > { %v606_v26 = vsel %vm604_vm3, %v600_v25, 0 }
 0x1ef   : > { %871 = vmatpush3.bf16.msra.mxu1 %v606_v26 }
 0x256   : > { %v581_v27 = vpop.f32.mrb[4].mxu0 }
 0x257   : > { %v868_v28 = vpop.f32.mrb[5].mxu0  ;;  %v588_v29 = vsel %vm587_vm4, %v581_v27, -inf }
 0x258   : > { %589 = vmax.xlane.f32.xlu0 %v588_v29  ;;  %v584_v30 = vpop.f32.mrb[6].mxu0 }
 0x259   : > { %v869_v31 = vpop.f32.mrb[7].mxu0 }
 0x2e5   : > { %v590_v32 = vpop.xlane.xlu0 %589 }
 0x2e6   : > { %v591_v33 = vsub.f32 %v581_v27, %v590_v32 }
 0x2e8   : > { %v592_v34 = vmul.f32 1.442695, %v591_v33 }
 0x2ea   : > { %974 = vpow2.f32 %v592_v34 }
 0x2f4   : > { %v975_v35 = vpop.eup %974 }
 0x2f5   : > { %v594_v36 = vsel %vm587_vm4, %v975_v35, 0.0 }
 0x2f6   : > { %595 = vadd.xlane.f32.xlu0 %v594_v36 }
 0x383   : > { %v596_v37 = vpop.xlane.xlu0 %595 }
 0x384   : > { %976 = vrcp.f32 %v596_v37 }
 0x38e   : > { %v977_v38 = vpop.eup %976 }
 0x38f   : > { %v598_v39 = vmul.f32 %v977_v38, %v975_v35 }
 0x391   : > { %v599_v40 = vpack.c.bf16 %v598_v39, %v598_v39 }
 0x393   : > { %873 = vmatmul.mubr.msk.bf16.vlgmr.msra.gmra.mrb[4].mxu1 %vm587_vm4, %v599_v40 }
 0x466   : > { %v642_v41 = vpop.f32.mrb[4].mxu1 }
 0x467   : > { %v648_v42 = vadd.f32 %v642_v41, %v470_v5  ;;  %v874_v43 = vpop.f32.mrb[5].mxu1 }
 0x468   : > { %v645_v44 = vpop.f32.mrb[6].mxu1 }
 0x469   : > { %v875_v45 = vpop.f32.mrb[7].mxu1  ;;  %v649_v46 = vsel %vm416_vm1, %v648_v42, 0.0 }
 0x46a   : > { %650 = vadd.xlane.f32.xlu1 %v649_v46 }
 0x4f7   : > { %v651_v47 = vpop.xlane.xlu1 %650 }
 0x4f8   : > { %v653_v48 = vmul.f32 0.03125, %v651_v47 }
 0x4fa   : > { %v654_v49 = vsub.f32 %v648_v42, %v653_v48 }
 0x4fc   : > { %v655_v50 = vmul.f32 %v654_v49, %v654_v49 }
 0x4fe   : > { %v656_v51 = vsel %vm416_vm1, %v655_v50, 0.0 }
 0x4ff   : > { %657 = vadd.xlane.f32.xlu0 %v656_v51 }
 0x58c   : > { %v658_v52 = vpop.xlane.xlu0 %657 }
 0x58d   : > { %v659_v53 = vmul.f32 0.03125, %v658_v52 }
 0x58f   : > { %v660_v54 = vadd.f32 1e-05, %v659_v53 }
 0x591   : > { %978 = vrsqrt.f32 %v660_v54 }
 0x59b   : > { %v979_v55 = vpop.eup %978 }
 0x59c   : > { %v662_v57 = vmul.f32 %v979_v55, %v654_v49 }
 0x59e   : > { %v670_v59 = vmul.f32 %v831_v56, %v662_v57 }
 0x5a0   : > { %v678_v60 = vadd.f32 %v832_v58, %v670_v59 }
 0x5a2   : > { %679 = vst.msk [vmem:[%s386_s14] sm:$0xff] %vm416_vm1, %v678_v60 }
 0x5a3   : > { %1109 = shalt.err (!%p1106_p3)
}
 0x5a4   : > { %s1110_s27 = scalar_lea.hbm %s1510_s15, 128  ;;  %s1114_s24 = scalar_lea.hbm %s1598_s13, 256 }
 0x5a5   : > { %p1111_p9 = scmp.ne.s32.totalorder %s1510_s15, %s1110_s27  ;;  %p1115_p7 = scmp.lt.u32.totalorder %s1510_s15, %s1598_s13 }
 0x5a6   : > { %p1116_p13 = scmp.lt.u32.totalorder %s1114_s24, %s1110_s27  ;;  %p1118_p2 = scmp.lt.u32.totalorder %s1110_s27, %s1510_s15 }
 0x5a7   : > { %p1112_p6 = pnand %p1111_p9, %p1402_p11 }
 0x5a8   : > { %p1117_p0 = por %p1116_p13, %p1115_p7 }
 0x5a9   : > { %p1113_p1 = pneg %p1112_p6 }
 0x5aa   : > { %p1119_p8 = por %p1118_p2, %p1117_p0 }
 0x5ac   : > { %p1120_p10 = pnand %p1119_p8, %p1113_p1 }
 0x5ae   : > { %1123 = shalt.err (!%p1120_p10)
}
 0x5af   : > { %888 = dma.vmem_to_hbm [thread:$0]  (%p1402_p11), %s1512_s17, 128, %s1510_s15, %s681_s18  }
 0x5b0 PF: > { %s1599_s14 = sld [smem:[#allocation18_spill]]  ;;  %s1600_s20 = sld [smem:[#allocation19_spill]] }
 0x5b1   : > { %p1602_p12 = scmp.ge.s32.totalorder %s1190_s10, 2 }
 0x5b6   : > { %s707_s25 = sand.u32 1, %s1599_s14   ;;  %p1601_p4 = scmp.ne.s32.totalorder %s1600_s20, 0 }
 0x5b7   : > { %s708_s21 = scalar_lea.sflag [#allocation6], %s707_s25 }
 0x5b8   : > { %p905_p5 = pnand %p1602_p12, %p1601_p4 }
 0x5ba   : > { %1165 = dma.done.wait (!%p905_p5), %s708_s21, 128  }
 0x5bb   : > { %1167 = vsyncadd (!%p905_p5), %s708_s21, 4294967168  ;;  %s26_s10 = sadd.s32 1, %s1190_s10   ;;  %s1603_s27 = smov %s1174_s28 }
 0x5bc   : > { %p23_p3 = scmp.ge.s32.totalorder %s26_s10, 4   ;;  %s1604_s28 = smov %s1178_s29 }
 0x5bd   : > { %s1605_s29 = smov %s1411_s19  ;;  %s1606_s30 = smov %s1186_s9 }
 0x5be   : > { %s1607_s9 = smov %s1609_s8  ;;  %25 = sbr.rel (!%p23_p3) target bundleno = 11 (0xb), region = 114 }
 0x5c5   :  { %713 = vsyncpa [#allocation5], 1 }
 0x5c6   :  { %715 = vsyncpa [#allocation5 + $0x1], 1 }
 0x5c7   :  { %716 = vsyncpa [#allocation8], 1 }
 0x5c8   :  { %717 = vsyncpa [#allocation11], 1 }
 0x5c9   :  { %718 = vsyncpa [#allocation6], 1 }
 0x5ca   :  { %720 = vsyncpa [#allocation6 + $0x1], 1 }

</bundles_post_ra>
